<compile_context>
chip_gen: v7x
topology: tpu7x:2x2x1
jax: 0.10.0
libtpu: 0.0.40
codegen_flags: <defaults>
</compile_context>

<pallas_src>
import jax
import jax.numpy as jnp
import numpy as np
from jax.experimental import pallas as pl
from jax.experimental.pallas import tpu as pltpu


# ---------------------------------------------------------------------------
# Buffer construction (PyTorch __init__ equivalent) — plain JAX, done once.
# ---------------------------------------------------------------------------
def make_positional_encodings(d_model: int, max_seq_len: int = 1000,
                              dtype=jnp.float32) -> jnp.ndarray:
    """Deterministic buffer construction, identical to the PyTorch __init__.

    Pre-cast to the activation dtype here so the per-call astype in the
    forward pass is a no-op (hoists the slice+convert out of the hot path).
    """
    assert d_model % 2 == 0, "d_model must be even (same constraint as PyTorch)"
    positions = np.arange(0, max_seq_len, dtype=np.float32)[:, None]          # (L, 1)
    div_term = np.exp(
        np.arange(0, d_model, 2, dtype=np.float32) * (-np.log(10000.0) / d_model)
    )                                                                          # (D/2,)
    pe = np.zeros((max_seq_len, d_model), dtype=np.float32)
    pe[:, 0::2] = np.sin(positions * div_term)
    pe[:, 1::2] = np.cos(positions * div_term)
    return jnp.asarray(pe, dtype=dtype)                                        # (L, D)


# ---------------------------------------------------------------------------
# Kernel: pure VPU add on lane-dense tiles.  Works for both paths:
#   row-tiled:   x (tR, LW)      + pe (tR, LW)
#   batch-tiled: x (bT, M, LW)   + pe (M, LW)   (broadcast over batch tile)
# ---------------------------------------------------------------------------
def _add_pe_kernel(x_ref, pe_ref, o_ref):
    o_ref[...] = x_ref[...] + pe_ref[...]


def _choose_lane_width(flat_len: int, d_model: int, max_lw: int = 2048) -> int:
    """Largest multiple-of-128 divisor of S*D (lane-dense, unmasked stores)."""
    best = 0
    lw = 128
    while lw <= min(flat_len, max_lw):
        if flat_len % lw == 0:
            best = lw
        lw += 128
    if best:
        return best
    # No multiple-of-128 divisor of S*D: keep the natural (S, D) view.
    # TODO(synk): pad D up to a multiple of 128 to recover unmasked stores.
    return d_model


def positional_encoding_forward(
    x: jnp.ndarray,
    pe_table: jnp.ndarray,
    *,
    target_block_bytes: int = 4 << 20,   # 2–4 MiB blocks: ~85%+ of HBM roofline
    xla_fallback_bytes: int = 256 * 1024,  # tiny tensors: let XLA fuse the add
    donate_x: bool = False,              # alias x's buffer to the output
) -> jnp.ndarray:
    """x: (B, S, D); pe_table: (max_seq_len, D). Returns x + pe[None, :S, :]."""
    B, S, D = x.shape
    max_seq_len, d_model = pe_table.shape
    if D != d_model:
        raise ValueError(f"d_model mismatch: x has D={D}, pe_table has {d_model}")
    if S > max_seq_len:
        raise ValueError(f"sequence length {S} exceeds max_seq_len {max_seq_len}")

    itemsize = jnp.dtype(x.dtype).itemsize

    # Slice + (no-op if pre-cast) convert.  Build the table with
    # make_positional_encodings(dtype=x.dtype) to keep this out of the hot path.
    pe = pe_table[:S]
    if pe.dtype != x.dtype:
        pe = pe.astype(x.dtype)

    # Tiny tensors: pallas_call fixed cost dominates; let XLA fuse the add.
    if B * S * D * itemsize < xla_fallback_bytes:
        return x + pe[None]

    # Lane-dense flattening of the per-batch (S, D) payload to (M, LW).
    flat = S * D
    LW = _choose_lane_width(flat, D)
    M = flat // LW
    payload_bytes = M * LW * itemsize            # bytes per batch element

    x2 = x.reshape(B, M, LW)
    pe2 = pe.reshape(M, LW)
    aliases = {0: 0} if donate_x else {}

    if B > 1 and payload_bytes * 2 <= target_block_bytes:
        # ---- batch-tiled path: small per-batch payload -------------------
        # Fold several batches into one block so DMAs stay MiB-scale instead
        # of B tiny grid steps dominated by per-step overhead.
        bT = max(1, min(B, target_block_bytes // payload_bytes))
        if pl.cdiv(B, bT) < 2 and B > 1:
            bT = pl.cdiv(B, 2)    # >=2 grid steps so v7x's 2 TCs both stream
        grid = (pl.cdiv(B, bT),)

        block_x_bytes = bT * payload_bytes
        # 2 buffers x (x + out) blocks + 2 x pe block + headroom; floor 32 MiB
        # (raises v5e's 16 MiB scoped default, still safe on v7x's 64 MiB VMEM).
        vmem_limit = max(int(2 * (2 * block_x_bytes + payload_bytes)) + (4 << 20),
                         32 << 20)

        out2 = pl.pallas_call(
            _add_pe_kernel,
            out_shape=jax.ShapeDtypeStruct((B, M, LW), x.dtype),
            grid=grid,
            in_specs=[
                pl.BlockSpec((bT, M, LW), lambda b: (b, 0, 0)),
                # PE block is constant across the grid -> stays VMEM-resident.
                pl.BlockSpec((M, LW), lambda b: (0, 0)),
            ],
            out_specs=pl.BlockSpec((bT, M, LW), lambda b: (b, 0, 0)),
            input_output_aliases=aliases,
            compiler_params=pltpu.CompilerParams(
                dimension_semantics=("parallel",),
                vmem_limit_bytes=vmem_limit,
            ),
        )(x2, pe2)
    else:
        # ---- row-tiled path: large per-batch payload ----------------------
        target_rows = max(1, target_block_bytes // (LW * itemsize))
        if M >= 8:
            tR = min(M, max(8, (target_rows // 8) * 8))   # multiple of 8 sublanes
        else:
            tR = M                                        # tiny M: block == full dim
        grid = (pl.cdiv(M, tR), B)   # batch innermost -> PE tile stays resident

        block_bytes = tR * LW * itemsize
        # 3 operands x 2 buffers x block + headroom; floor 32 MiB (see above).
        # (PE only changes on the outer axis, so pl.Buffered(1) on its spec
        # could reclaim one block of VMEM; left at default depth for safety.)
        vmem_limit = max(int(6 * block_bytes) + (4 << 20), 32 << 20)

        out2 = pl.pallas_call(
            _add_pe_kernel,
            out_shape=jax.ShapeDtypeStruct((B, M, LW), x.dtype),
            grid=grid,
            in_specs=[
                # x: squeeze the batch dim; kernel sees a (tR, LW) tile.
                pl.BlockSpec((None, tR, LW), lambda r, b: (b, r, 0)),
                # PE: block index depends only on the row tile -> reused across b.
                pl.BlockSpec((tR, LW), lambda r, b: (r, 0)),
            ],
            out_specs=pl.BlockSpec((None, tR, LW), lambda r, b: (b, r, 0)),
            input_output_aliases=aliases,
            compiler_params=pltpu.CompilerParams(
                dimension_semantics=("parallel", "parallel"),
                vmem_limit_bytes=vmem_limit,
            ),
        )(x2, pe2)

    return out2.reshape(B, S, D)


if __name__ == "__main__":
    MAX_SEQ_LEN = 1000
    key = jax.random.PRNGKey(0)

    def reference(x, pe_table):
        S = x.shape[1]
        return x + pe_table[:S].astype(x.dtype)[None]

    # (B, S, D, dtype, forward kwargs)
    cases = [
        # tiny, lane-dense (LW=256), forced through the Pallas batch-tiled path
        (2, 8, 32, jnp.float32, dict(xla_fallback_bytes=0)),
        # S*D=576 not a multiple of 128 -> lane-width fallback (masked stores)
        (2, 12, 48, jnp.float32, dict(xla_fallback_bytes=0)),
        # row-tiled path with multiple row tiles + a partial last tile (M=25, tR=8)
        (3, 250, 128, jnp.float32, dict(xla_fallback_bytes=0,
                                        target_block_bytes=64 * 1024)),
        # bf16 + batch-tiled path (PE broadcast inside the kernel)
        (8, 8, 128, jnp.bfloat16, dict(xla_fallback_bytes=0)),
        # aliased (donated) input buffer
        (4, 16, 64, jnp.float32, dict(xla_fallback_bytes=0, donate_x=True)),
        # default config: tiny tensor takes the XLA-fused fallback path
        (2, 8, 32, jnp.float32, dict()),
    ]

    for idx, (B, S, D, dtype, kwargs) in enumerate(cases):
        key, sub = jax.random.split(key)
        x = jax.random.normal(sub, (B, S, D), dtype=jnp.float32).astype(dtype)
        pe_table = make_positional_encodings(D, MAX_SEQ_LEN, dtype=dtype)

        out = positional_encoding_forward(x, pe_table, **kwargs)
        out = jax.block_until_ready(out)

        ref = reference(x, pe_table)
        tol = 1e-6 if dtype == jnp.float32 else 1e-2
        np.testing.assert_allclose(
            np.asarray(out.astype(jnp.float32)),
            np.asarray(ref.astype(jnp.float32)),
            rtol=tol, atol=tol,
            err_msg=f"case {idx}: B={B} S={S} D={D} dtype={dtype} kwargs={kwargs}",
        )

    print("KERNEL_OK")
</pallas_src>

<mosaic_0001>
module attributes {stable_mosaic.version = 11 : i64} {
  func.func @_add_pe_kernel(%arg0: i32, %arg1: memref<1x1x256xf32, #tpu.memory_space<vmem>>, %arg2: memref<1x256xf32, #tpu.memory_space<vmem>>, %arg3: memref<1x1x256xf32, #tpu.memory_space<vmem>>) attributes {dimension_semantics = [#tpu.dimension_semantics<parallel>], iteration_bounds = array<i64: 2>, scalar_prefetch = 0 : i64, scratch_operands = 0 : i64, tpu.core_type = #tpu.core_type<tc>, window_params = [{transform_indices = @transform_0, window_bounds = array<i64: 1, 1, 256>}, {pipeline_mode = #tpu.pipeline_mode<synchronous>, transform_indices = @transform_1, window_bounds = array<i64: 1, 256>}, {transform_indices = @transform_2, window_bounds = array<i64: 1, 1, 256>}]} {
    %c0 = arith.constant 0 : index
    %c0_0 = arith.constant 0 : index
    %c0_1 = arith.constant 0 : index
    %0 = vector.load %arg1[%c0, %c0_0, %c0_1] : memref<1x1x256xf32, #tpu.memory_space<vmem>>, vector<1x1x256xf32>
    %c0_2 = arith.constant 0 : index
    %c0_3 = arith.constant 0 : index
    %1 = vector.load %arg2[%c0_2, %c0_3] : memref<1x256xf32, #tpu.memory_space<vmem>>, vector<1x256xf32>
    %2 = vector.shape_cast %1 : vector<1x256xf32> to vector<1x1x256xf32>
    %3 = arith.addf %0, %2 : vector<1x1x256xf32>
    %c0_4 = arith.constant 0 : index
    %c0_5 = arith.constant 0 : index
    %c0_6 = arith.constant 0 : index
    %4 = vector.load %arg3[%c0_4, %c0_5, %c0_6] : memref<1x1x256xf32, #tpu.memory_space<vmem>>, vector<1x1x256xf32>
    tpu.vector_store %arg3[%c0_4, %c0_5, %c0_6], %3 {strides = array<i32>} : memref<1x1x256xf32, #tpu.memory_space<vmem>>, vector<1x1x256xf32>,
    return
  }
  func.func @transform_0(%arg0: i32) -> (i32, i32, i32) {
    %c0_i32 = arith.constant 0 : i32
    %c0_i32_0 = arith.constant 0 : i32
    %c0_i32_1 = arith.constant 0 : i32
    return %arg0, %c0_i32, %c0_i32_0 : i32, i32, i32
  }
  func.func @transform_1(%arg0: i32) -> (i32, i32) {
    %c0_i32 = arith.constant 0 : i32
    %c0_i32_0 = arith.constant 0 : i32
    %c0_i32_1 = arith.constant 0 : i32
    return %c0_i32, %c0_i32_0 : i32, i32
  }
  func.func @transform_2(%arg0: i32) -> (i32, i32, i32) {
    %c0_i32 = arith.constant 0 : i32
    %c0_i32_0 = arith.constant 0 : i32
    %c0_i32_1 = arith.constant 0 : i32
    return %arg0, %c0_i32, %c0_i32_0 : i32, i32, i32
  }
}

</mosaic_0001>

<bundles_post_ra>
// kernel: tpu_custom_call.1
= control target key start
LH: loop header
LB: loop body
LE: loop exit
PB: predicated region body
PF: predicated region fallthrough
CT: control target
= control target key end

     0   :  { %7 = vsyncpa [#allocation3], 0  ;;  %s594_s0 = inlined_call_operand.hbm [shape: f32[2,1,256], index: 0, kind: input, shape index: {}]   ;;  %s595_s1 = inlined_call_operand.vmem [shape: f32[1,256], index: 1, kind: input, shape index: {}]   ;;  %s596_s2 = inlined_call_operand.hbm [shape: f32[2,1,256], index: 2, kind: output, shape index: {}]  }
   0x1   :  { %9 = vsyncpa [#allocation3 + $0x1], 0 }
   0x2   :  { %10 = vsyncpa [#allocation4], 0 }
   0x3   :  { %12 = vsyncpa [#allocation4 + $0x1], 0  ;;  %s430_s9 = smov 0   ;;  %s432_s10 = smov 0  }
   0x4   :  { %s434_s11 = smov 0   ;;  %s436_s12 = smov 0  }
   0x5 LB: > { %s451_s13 = sadd.s32 4294967295, %s411_s12   ;;  %s253_s14 = sadd.s32 4294967294, %s411_s12   ;;  %s411_s12 = sphi %s436_s12, %s611_s12   ;;  %s407_s11 = sphi %s434_s11, %s610_s11   ;;  %s403_s10 = sphi %s432_s10, %s609_s10   ;;  %s399_s9 = sphi %s430_s9, %s608_s9  }
   0x6   : > { %s455_s15 = sadd.s32 1, %s411_s12   ;;  %s25_s16 = sadd.s32 1, %s407_s11 }
   0x7   : > { %s22_s17 = ssub.s32 %s411_s12, %s455_s15  ;;  %p32_p0 = scmp.ne.s32.totalorder %s407_s11, %s403_s10 }
   0x8   : > { %p23_p1 = scmp.eq.s32.totalorder %s22_s17, 0  ;;  %p33_p2 = scmp.eq.s32.totalorder %s411_s12, 0 }
   0x9   : > { %p38_p3 = scmp.ne.s32.totalorder %s403_s10, %s399_s9  ;;  %p39_p4 = scmp.eq.s32.totalorder %s451_s13, 0 }
   0xa   : > { %s467_s18 = scalar_select %p23_p1, %s407_s11, %s25_s16  }
   0xb   : > { %p469_p5 = por %p33_p2, %p32_p0  ;;  %p473_p6 = por %p39_p4, %p38_p3 }
   0xc   : > { %p83_p7 = scmp.eq.s32.totalorder %s451_s13, 1  ;;  %p89_p8 = scmp.eq.s32.totalorder %s253_s14, 1 }
   0xd   : > { %p281_p10 = scmp.lt.s32.totalorder %s411_s12, 2  ;;  %s112_s23 = sand.u32 1, %s407_s11  }
   0xe   : > { %p480_p11 = por %p83_p7, %p32_p0  ;;  %p484_p12 = por %p89_p8, %p38_p3 }
   0xf   : > { %s267_s24 = sshll.u32 %s411_s12, 5  ;;  %s256_s25 = sshll.u32 %s112_s23, 1 }
  0x10   : > { %s600_s21 = scalar_select %p480_p11, 1, 0 }
  0x11   : > { %s601_s22 = scalar_select %p484_p12, 1, 0 }
  0x12   : > { %s493_s28 = scalar_lea.hbm %s594_s0, %s267_s24  ;;  %s116_s29 = scalar_lea.vmem [#allocation2], %s256_s25 }
  0x13   : > { %s124_s30 = sshll.u32 %s116_s29, 4  ;;  %p497_p13 = pnand %p281_p10, %p469_p5  ;;  %s501_s30 = int_to_ptr.vmem [resolvable:$true] %s124_s30 }
  0x14   : > { %s113_s4 = scalar_lea.sflag [#allocation3], %s112_s23  ;;  %s315_s5 = scalar_lea.hbm %s493_s28, 32 }
  0x15   : > { %p316_p2 = scmp.ne.s32.totalorder %s493_s28, %s315_s5  ;;  %p317_p3 = pneg %p497_p13 }
  0x16   : > { %s320_s8 = scalar_lea.hbm %s594_s0, 64  ;;  %p321_p5 = scmp.lt.u32.totalorder %s493_s28, %s594_s0 }
  0x17   : > { %p318_p4 = pnand %p317_p3, %p316_p2  ;;  %p322_p8 = scmp.lt.u32.totalorder %s320_s8, %s315_s5 }
  0x18   : > { %p324_p9 = scmp.lt.u32.totalorder %s315_s5, %s493_s28 }
  0x19   : > { %p319_p7 = pneg %p318_p4  ;;  %p323_p10 = por %p322_p8, %p321_p5 }
  0x1b   : > { %p325_p0 = por %p324_p9, %p323_p10 }
  0x1d   : > { %p326_p1 = pnand %p325_p0, %p319_p7 }
  0x1f   : > { %329 = shalt.err (!%p326_p1)
}
  0x20   : > { %s330_s17 = scalar_lea.vmem %s501_s30, 32  ;;  %s413_s19 = smov [#allocation2]  }
  0x21   : > { %p331_p2 = scmp.ne.s32.totalorder %s501_s30, %s330_s17  ;;  %s335_s23 = sshll.u32 %s413_s19, 4  ;;  %s336_s23 = int_to_ptr.vmem [resolvable:$false] %s335_s23 }
  0x22   : > { %s337_s24 = scalar_lea.vmem %s336_s23, 64  ;;  %p338_p11 = scmp.lt.s32.totalorder %s501_s30, %s336_s23 }
  0x23   : > { %p333_p4 = pnand %p331_p2, %p317_p3  ;;  %p339_p5 = scmp.lt.s32.totalorder %s337_s24, %s330_s17 }
  0x25   : > { %p334_p12 = pneg %p333_p4  ;;  %p340_p8 = por %p339_p5, %p338_p11 }
  0x27   : > { %p341_p9 = pnand %p340_p8, %p334_p12 }
  0x29   : > { %344 = shalt.err (!%p341_p9)
}
  0x2a   : > { %276 = dma.hbm_to_vmem [thread:$0]  (!%p497_p13), %s493_s28, 32, %s501_s30, %s113_s4  }
  0x2b   : > { %p603_p0 = scmp.lt.s32.totalorder %s411_s12, 3  ;;  %p604_p1 = scmp.ge.s32.totalorder %s411_s12, 1 }
  0x2d   : > { %p130_p3 = pnand %p604_p1, %p603_p0 }
  0x2e   : > { %s535_s25 = sand.u32 (!%p130_p3), 1, %s403_s10  }
  0x2f   : > { %133 = sbr.rel (%p130_p3) target bundleno = 81 (0x51), region = 28  ;;  %s260_s26 = sshll.u32 (!%p130_p3), %s535_s25, 1 }
  0x30   : > { %s136_s27 = scalar_lea.sflag (!%p130_p3), [#allocation3], %s535_s25  ;;  %s139_s29 = scalar_lea.vmem (!%p130_p3), [#allocation2], %s260_s26 }
  0x36   : > { %390 = dma.done.wait (%p473_p6), %s136_s27, 32  }
  0x37   : > { %392 = vsyncadd (%p473_p6), %s136_s27, 4294967264  ;;  %v163_v0 = vlaneseq  ;;  %s159_s28 = scalar_lea.vmem [#allocation5], %s260_s26  ;;  %s268_s3 = sshll.u32 %s451_s13, 5  ;;  %v160_v1 = vld [vmem:[%s139_s29] sm:$0x3] }
  0x38   : > { %s183_s30 = sshll.u32 %s159_s28, 4  ;;  %v161_v2 = vld [vmem:[%s595_s1] sm:$0x3]  ;;  %s552_s20 = scalar_lea.hbm %s596_s2, %s268_s3  ;;  %s547_s30 = int_to_ptr.vmem [resolvable:$true] %s183_s30 }
  0x39   : > { %vm165_vm0 = vcmp.lt.s32.totalorder %v163_v0, 256  ;;  %v162_v3 = vadd.f32 %v161_v2, %v160_v1  ;;  %s169_s8 = scalar_lea.sflag [#allocation4], %s535_s25  ;;  %s345_s13 = scalar_lea.vmem %s547_s30, 32 }
  0x3a   : > { %p346_p6 = scmp.ne.s32.totalorder %s547_s30, %s345_s13  ;;  %p605_p11 = scmp.ne.s32.totalorder %s600_s21, 0 }
  0x3b   : > { %167 = vst.msk [vmem:[%s159_s28] sm:$0x3] %vm165_vm0, %v162_v3  ;;  %s414_s14 = smov [#allocation5]  }
  0x3c   : > { %p347_p12 = pnand %p346_p6, %p605_p11  ;;  %s349_s16 = sshll.u32 %s414_s14, 4  ;;  %s350_s16 = int_to_ptr.vmem [resolvable:$false] %s349_s16 }
  0x3d   : > { %s351_s17 = scalar_lea.vmem %s350_s16, 64  ;;  %p352_p7 = scmp.lt.s32.totalorder %s547_s30, %s350_s16 }
  0x3e   : > { %p348_p13 = pneg %p347_p12  ;;  %p353_p10 = scmp.lt.s32.totalorder %s351_s17, %s345_s13 }
  0x40   : > { %p354_p2 = por %p353_p10, %p352_p7 }
  0x42   : > { %p355_p4 = pnand %p354_p2, %p348_p13 }
  0x44   : > { %358 = shalt.err (!%p355_p4)
}
  0x45   : > { %s359_s19 = scalar_lea.hbm %s552_s20, 32  ;;  %s363_s25 = scalar_lea.hbm %s596_s2, 64 }
  0x46   : > { %p360_p5 = scmp.ne.s32.totalorder %s552_s20, %s359_s19  ;;  %p364_p0 = scmp.lt.u32.totalorder %s552_s20, %s596_s2 }
  0x47   : > { %p365_p1 = scmp.lt.u32.totalorder %s363_s25, %s359_s19  ;;  %p367_p6 = scmp.lt.u32.totalorder %s359_s19, %s552_s20 }
  0x48   : > { %p361_p8 = pnand %p360_p5, %p605_p11 }
  0x49   : > { %p366_p3 = por %p365_p1, %p364_p0 }
  0x4a   : > { %p362_p9 = pneg %p361_p8 }
  0x4b   : > { %p368_p12 = por %p367_p6, %p366_p3 }
  0x4d   : > { %p369_p13 = pnand %p368_p12, %p362_p9 }
  0x4f   : > { %372 = shalt.err (!%p369_p13)
}
  0x50   : > { %271 = dma.vmem_to_hbm [thread:$0]  (%p605_p11), %s547_s30, 32, %s552_s20, %s169_s8  }
  0x51 PF: > { %s195_s29 = sand.u32 1, %s399_s9   ;;  %p606_p7 = scmp.ne.s32.totalorder %s601_s22, 0 }
  0x52   : > { %p607_p10 = scmp.ge.s32.totalorder %s411_s12, 2  ;;  %s196_s28 = scalar_lea.sflag [#allocation4], %s195_s29 }
  0x54   : > { %p278_p2 = pnand %p607_p10, %p606_p7 }
  0x56   : > { %394 = dma.done.wait (!%p278_p2), %s196_s28, 32  }
  0x57   : > { %396 = vsyncadd (!%p278_p2), %s196_s28, 4294967264  ;;  %p15_p4 = scmp.ge.s32.totalorder %s455_s15, 4   ;;  %s608_s9 = smov %s403_s10 }
  0x58   : > { %s609_s10 = smov %s407_s11  ;;  %s610_s11 = smov %s467_s18 }
  0x59   : > { %s611_s12 = smov %s455_s15  ;;  %17 = sbr.rel (!%p15_p4) target bundleno = 5 (0x5), region = 73 }
  0x60   :  { %201 = vsyncpa [#allocation3], 1 }
  0x61   :  { %203 = vsyncpa [#allocation3 + $0x1], 1 }
  0x62   :  { %204 = vsyncpa [#allocation4], 1 }
  0x63   :  { %206 = vsyncpa [#allocation4 + $0x1], 1 }

</bundles_post_ra>
